<compile_context>
chip_gen: v7x
topology: tpu7x:2x2x1
jax: 0.10.0
libtpu: 0.0.40
codegen_flags: <defaults>
</compile_context>

<pallas_src>
import functools
import math

import jax
import jax.numpy as jnp
from jax.experimental import pallas as pl
from jax.experimental.pallas import tpu as pltpu

_DEFAULT_MAX_TILE_N = 16384


def _round_up(x, m):
    return -(-x // m) * m


def _cdiv(a, b):
    return -(-a // b)


def _plan_tiling(num_train, bit, n_class, bank_dtype, max_tile_n):
    """Tile plan shared by the bank constructor and the loss kernel."""
    bank_bytes = jnp.dtype(bank_dtype).itemsize
    nt128 = _round_up(num_train, 128)
    # Streaming-slab budget: triple-buffered stacked-bank tiles must stay well
    # inside the smallest-VMEM generation (v7x: 64 MiB phys / 32 MiB scoped).
    budget = 16 << 20
    per_col = 3 * (bit + n_class) * bank_bytes
    tile_cap = max(128, min(max_tile_n, (budget // per_col) // 128 * 128))
    if nt128 <= tile_cap:
        tile_n, n_tiles = nt128, 1
    else:
        # Even tile count => the leading "parallel" axis always gives both v7x
        # TensorCores equal work; padding stays bounded by ~n_tiles * 128 cols.
        n_tiles = _round_up(_cdiv(nt128, tile_cap), 2)
        tile_n = _round_up(_cdiv(nt128, n_tiles), 128)
    padded_nt = n_tiles * tile_n
    num_chunks = 2 if n_tiles >= 2 else 1
    tiles_per_chunk = n_tiles // num_chunks
    return tile_n, n_tiles, num_chunks, tiles_per_chunk, padded_nt


def _default_bank_buffers():
    # v5e has the lowest HBM bandwidth; a third stream buffer smooths exposed
    # DMA there.  Keep the (well-tested) double-buffered default elsewhere.
    try:
        kind = jax.devices()[0].device_kind.lower()
    except Exception:
        return 2
    if "v5" in kind and ("lite" in kind or "v5e" in kind):
        return 3
    return 2


def bank_from_uy(U, Y, *, bank_dtype=jnp.bfloat16,
                 max_tile_n=_DEFAULT_MAX_TILE_N):
    """Build the persistent stacked/padded code+label bank from f32 U, Y.

    Note: for strictly one/multi-hot labels the bf16 cast keeps (y @ Y > 0)
    exact; for soft labels with tiny weights use bank_dtype=float32.
    """
    bit, num_train = U.shape
    n_class = Y.shape[0]
    *_, padded_nt = _plan_tiling(num_train, bit, n_class, bank_dtype,
                                 max_tile_n)
    bank = jnp.zeros((bit + n_class, padded_nt), bank_dtype)
    bank = bank.at[:bit, :num_train].set(U.astype(bank_dtype))
    bank = bank.at[bit:, :num_train].set(Y.astype(bank_dtype))
    return bank


def _dsdh_likelihood_kernel(q_ref, bank_ref, acc_ref, *, batch_p):
    """Accumulate per-(row, bank-column) likelihood terms for one bank tile."""
    @pl.when(pl.program_id(1) == 0)
    def _():
        acc_ref[...] = jnp.zeros_like(acc_ref)

    # Fused block-diagonal matmul: rows [0, batch_p) give u @ U_tile,
    # rows [batch_p, 2*batch_p) give y @ Y_tile.
    prod = jnp.dot(q_ref[...], bank_ref[...],
                   preferred_element_type=jnp.float32)
    ip = prod[:batch_p, :] * 0.5
    s_pos = prod[batch_p:, :] > 0.0

    # log1p(exp(-|ip|)) + relu(ip) - s*ip  ==  softplus(-|ip|) + relu(s ? -ip : ip)
    ll = (jnp.log1p(jnp.exp(-jnp.abs(ip)))
          + jnp.maximum(jnp.where(s_pos, -ip, ip), 0.0))

    # Pure VPU elementwise accumulate; the scalar reduction happens once in
    # the JAX wrapper (better f32 accuracy, no per-step cross-lane reduce).
    acc_ref[...] += ll


def dsdh_loss(u, y, ind, bank, B, W, *, num_train, mu, nu,
              max_tile_n=_DEFAULT_MAX_TILE_N, bank_buffers=None):
    """Functional DSDHLoss.forward.

    `bank` is the persistent stacked (bit + n_class, padded_nt) code/label
    bank in its streaming dtype (see bank_from_uy).  Returns (loss, bank_new);
    jit with donate_argnums on `bank` so the column scatter is in-place.
    """
    batch, bit = u.shape
    n_class = y.shape[1]
    bank_dtype = bank.dtype
    bank_bytes = jnp.dtype(bank_dtype).itemsize

    tile_n, n_tiles, num_chunks, tiles_per_chunk, padded_nt = _plan_tiling(
        num_train, bit, n_class, bank_dtype, max_tile_n)
    assert bank.shape == (bit + n_class, padded_nt), (
        "bank layout does not match the tile plan; build it with bank_from_uy "
        "using the same bank_dtype / max_tile_n",
        bank.shape, (bit + n_class, padded_nt))

    if bank_buffers is None:
        bank_buffers = _default_bank_buffers()

    # ---- state update: scatter new codes/labels straight into the persistent
    #      bank (already in bank_dtype / padded layout — no full-bank copy).
    upd = jnp.concatenate([u.T, y.T], axis=0).astype(bank_dtype)
    bank_new = bank.at[:, ind].set(upd)

    # ---- block-diagonal query [[u, 0], [0, y]] (tiny; rebuilt per call) -----
    batch_p = _round_up(max(batch, 8), 8)
    q = jnp.zeros((2 * batch_p, bit + n_class), bank_dtype)
    q = q.at[:batch, :bit].set(u.astype(bank_dtype))
    q = q.at[batch_p:batch_p + batch, bit:].set(y.astype(bank_dtype))

    kernel = functools.partial(_dsdh_likelihood_kernel, batch_p=batch_p)

    bank_block = (bit + n_class) * tile_n * bank_bytes
    q_block = 2 * batch_p * (bit + n_class) * bank_bytes
    acc_block = batch_p * tile_n * 4
    vmem_est = bank_buffers * bank_block + 2 * q_block + 2 * acc_block
    vmem_limit = int(min(max(2 * vmem_est, 16 << 20), 32 << 20))

    cost = pl.CostEstimate(
        flops=int(2 * (2 * batch_p) * (bit + n_class) * padded_nt),
        transcendentals=int(2 * batch_p * padded_nt),
        bytes_accessed=int((bit + n_class) * padded_nt * bank_bytes
                           + 2 * batch_p * (bit + n_class) * bank_bytes
                           + num_chunks * batch_p * tile_n * 4))

    bank_spec_kwargs = {}
    if bank_buffers != 2:
        bank_spec_kwargs["pipeline_mode"] = pl.Buffered(bank_buffers)

    partial_ll = pl.pallas_call(
        kernel,
        out_shape=jax.ShapeDtypeStruct((num_chunks * batch_p, tile_n),
                                       jnp.float32),
        grid_spec=pltpu.PrefetchScalarGridSpec(
            num_scalar_prefetch=0,
            grid=(num_chunks, tiles_per_chunk),
            in_specs=[
                pl.BlockSpec((2 * batch_p, bit + n_class),
                             lambda c, j: (0, 0)),                       # query
                pl.BlockSpec((bit + n_class, tile_n),
                             lambda c, j: (0, c * tiles_per_chunk + j),
                             **bank_spec_kwargs),                        # bank
            ],
            out_specs=pl.BlockSpec((batch_p, tile_n), lambda c, j: (c, 0)),
        ),
        compiler_params=pltpu.CompilerParams(
            dimension_semantics=("parallel", "arbitrary"),
            vmem_limit_bytes=vmem_limit),
        cost_estimate=cost,
    )(q, bank_new)

    # Padded query rows / padded bank columns are exact zeros, so each padded
    # (row, column) pair contributed exactly softplus(0) = log 2.
    pad_pairs = batch_p * padded_nt - batch * num_train
    likelihood = ((jnp.sum(partial_ll) - pad_pairs * math.log(2.0))
                  / float(batch * num_train))

    # ---- tiny classification / regularization terms (plain JAX) -------------
    # mean((y.T - W.T @ B[:, ind])^2) == mean((y - B[:, ind].T @ W)^2)
    pred = B[:, ind].T.astype(jnp.float32) @ W.astype(jnp.float32)
    cl = jnp.mean((y - pred) ** 2)
    reg = jnp.mean(W ** 2)

    loss = likelihood + mu * cl + nu * reg
    return loss, bank_new


def _reference(u, y, ind, U, B, Y, W, mu, nu):
    U = U.at[:, ind].set(u.T)
    Y = Y.at[:, ind].set(y.T)
    ip = u @ U * 0.5
    s = (y @ Y > 0).astype(jnp.float32)
    ll = jnp.log(1.0 + jnp.exp(-jnp.abs(ip))) + jnp.maximum(ip, 0.0) - s * ip
    likelihood = jnp.mean(ll)
    cl = jnp.mean((y.T - W.T @ B[:, ind]) ** 2)
    reg = jnp.mean(W ** 2)
    return likelihood + mu * cl + nu * reg


if __name__ == "__main__":
    # Small deterministic problem; num_train / batch deliberately NOT multiples
    # of the tile sizes so the padding-correction path is exercised.
    bit = 32
    num_train = 1000
    n_class = 8
    batch = 4
    mu, nu = 1.0, 0.1

    key = jax.random.PRNGKey(0)
    k_u, k_y, k_ind, k_B, k_W, k_Y0 = jax.random.split(key, 6)

    u = jax.random.normal(k_u, (batch, bit), dtype=jnp.float32)
    labels = jax.random.randint(k_y, (batch,), 0, n_class)
    y = jax.nn.one_hot(labels, n_class, dtype=jnp.float32)
    ind = jax.random.permutation(k_ind, num_train)[:batch].astype(jnp.int32)

    # module state (deterministic synthetic init; __init__ zeros U/B/Y,
    # W/B would normally come from updateBandW)
    U0 = jnp.zeros((bit, num_train), jnp.float32)
    Y0 = jax.nn.one_hot(
        jax.random.randint(k_Y0, (num_train,), 0, n_class), n_class,
        dtype=jnp.float32).T                            # (n_class, num_train)
    B0 = jnp.sign(jax.random.normal(k_B, (bit, num_train), jnp.float32))
    W0 = 0.1 * jax.random.normal(k_W, (bit, n_class), jnp.float32)
    # TODO(synk): updateBandW (DCC iterations with a matrix inverse) is
    # host-side training logic, not part of the forward hot path.

    ref = jax.block_until_ready(_reference(u, y, ind, U0, B0, Y0, W0, mu, nu))

    # Exact f32 bank (small max_tile_n forces the multi-tile / 2-chunk path).
    bank32 = bank_from_uy(U0, Y0, bank_dtype=jnp.float32, max_tile_n=256)
    step32 = jax.jit(
        functools.partial(dsdh_loss, num_train=num_train, mu=mu, nu=nu,
                          max_tile_n=256),
        donate_argnums=(3,))
    loss32, bank32 = step32(u, y, ind, bank32, B0, W0)
    loss32 = jax.block_until_ready(loss32)
    assert jnp.allclose(loss32, ref, rtol=1e-5, atol=1e-5), (loss32, ref)

    # Default bf16 bank (half the streamed bytes): looser tolerance.
    bank16 = bank_from_uy(U0, Y0)
    step16 = jax.jit(
        functools.partial(dsdh_loss, num_train=num_train, mu=mu, nu=nu),
        donate_argnums=(3,))
    loss16, bank16 = step16(u, y, ind, bank16, B0, W0)
    loss16 = jax.block_until_ready(loss16)
    assert jnp.allclose(loss16, ref, rtol=1e-2, atol=1e-2), (loss16, ref)

    print("KERNEL_OK")
</pallas_src>

<mosaic_0001>
module attributes {stable_mosaic.version = 11 : i64} {
  func.func @_dsdh_likelihood_kernel(%arg0: i32, %arg1: i32, %arg2: memref<16x40xf32, #tpu.memory_space<vmem>>, %arg3: memref<40x256xf32, #tpu.memory_space<vmem>>, %arg4: memref<8x256xf32, #tpu.memory_space<vmem>>) attributes {dimension_semantics = [#tpu.dimension_semantics<parallel>, #tpu.dimension_semantics<arbitrary>], iteration_bounds = array<i64: 2, 2>, scalar_prefetch = 0 : i64, scratch_operands = 0 : i64, tpu.core_type = #tpu.core_type<tc>, window_params = [{pipeline_mode = #tpu.pipeline_mode<synchronous>, transform_indices = @transform_0, window_bounds = array<i64: 16, 40>}, {transform_indices = @transform_1, window_bounds = array<i64: 40, 256>}, {transform_indices = @transform_2, window_bounds = array<i64: 8, 256>}]} {
    %c0_i32 = arith.constant 0 : i32
    %0 = arith.cmpi eq, %arg1, %c0_i32 : i32
    %1 = arith.extui %0 : i1 to i32
    %c0_i32_0 = arith.constant 0 : i32
    %2 = arith.cmpi ne, %1, %c0_i32_0 : i32
    scf.if %2 {
      %cst_13 = arith.constant 0.000000e+00 : f32
      %26 = vector.broadcast %cst_13 : f32 to vector<8x256xf32>
      %c0_14 = arith.constant 0 : index
      %c0_15 = arith.constant 0 : index
      %27 = vector.load %arg4[%c0_14, %c0_15] : memref<8x256xf32, #tpu.memory_space<vmem>>, vector<8x256xf32>
      tpu.vector_store %arg4[%c0_14, %c0_15], %26 {strides = array<i32>} : memref<8x256xf32, #tpu.memory_space<vmem>>, vector<8x256xf32>,
    } else {
    }
    %c0 = arith.constant 0 : index
    %c0_1 = arith.constant 0 : index
    %3 = vector.load %arg2[%c0, %c0_1] : memref<16x40xf32, #tpu.memory_space<vmem>>, vector<16x40xf32>
    %c0_2 = arith.constant 0 : index
    %c0_3 = arith.constant 0 : index
    %4 = vector.load %arg3[%c0_2, %c0_3] : memref<40x256xf32, #tpu.memory_space<vmem>>, vector<40x256xf32>
    %cst = arith.constant dense<0.000000e+00> : vector<16x256xf32>
    %5 = tpu.matmul %3, %4, %cst {dimension_numbers = #tpu.dot_dimension_numbers<[1], [0], [0], [1], [0, 0, 1, 1], [], []>} : vector<16x40xf32>, vector<40x256xf32>, vector<16x256xf32> -> vector<16x256xf32>
    %6 = vector.extract_strided_slice %5 {offsets = [0, 0], sizes = [8, 256], strides = [1, 1]} : vector<16x256xf32> to vector<8x256xf32>
    %cst_4 = arith.constant 5.000000e-01 : f32
    %7 = vector.broadcast %cst_4 : f32 to vector<8x256xf32>
    %8 = arith.mulf %6, %7 : vector<8x256xf32>
    %9 = vector.extract_strided_slice %5 {offsets = [8, 0], sizes = [8, 256], strides = [1, 1]} : vector<16x256xf32> to vector<8x256xf32>
    %cst_5 = arith.constant 0.000000e+00 : f32
    %10 = vector.broadcast %cst_5 : f32 to vector<8x256xf32>
    %11 = arith.cmpf ogt, %9, %10 : vector<8x256xf32>
    %12 = math.absf %8 : vector<8x256xf32>
    %cst_6 = arith.constant 0.000000e+00 : f32
    %13 = vector.broadcast %cst_6 : f32 to vector<8x256xf32>
    %14 = arith.subf %13, %12 : vector<8x256xf32>
    %15 = math.exp %14 : vector<8x256xf32>
    %16 = math.log1p %15 : vector<8x256xf32>
    %cst_7 = arith.constant 0.000000e+00 : f32
    %17 = vector.broadcast %cst_7 : f32 to vector<8x256xf32>
    %18 = arith.subf %17, %8 : vector<8x256xf32>
    %19 = arith.select %11, %18, %8 : vector<8x256xi1>, vector<8x256xf32>
    %cst_8 = arith.constant 0.000000e+00 : f32
    %20 = vector.broadcast %cst_8 : f32 to vector<8x256xf32>
    %21 = arith.maximumf %19, %20 : vector<8x256xf32>
    %22 = arith.addf %16, %21 : vector<8x256xf32>
    %c0_9 = arith.constant 0 : index
    %c0_10 = arith.constant 0 : index
    %23 = vector.load %arg4[%c0_9, %c0_10] : memref<8x256xf32, #tpu.memory_space<vmem>>, vector<8x256xf32>
    %24 = arith.addf %23, %22 : vector<8x256xf32>
    %c0_11 = arith.constant 0 : index
    %c0_12 = arith.constant 0 : index
    %25 = vector.load %arg4[%c0_11, %c0_12] : memref<8x256xf32, #tpu.memory_space<vmem>>, vector<8x256xf32>
    tpu.vector_store %arg4[%c0_11, %c0_12], %24 {strides = array<i32>} : memref<8x256xf32, #tpu.memory_space<vmem>>, vector<8x256xf32>,
    return
  }
  func.func @transform_0(%arg0: i32, %arg1: i32) -> (i32, i32) {
    %c0_i32 = arith.constant 0 : i32
    %c0_i32_0 = arith.constant 0 : i32
    %c0_i32_1 = arith.constant 0 : i32
    return %c0_i32, %c0_i32_0 : i32, i32
  }
  func.func @transform_1(%arg0: i32, %arg1: i32) -> (i32, i32) {
    %c2_i32 = arith.constant 2 : i32
    %0 = arith.muli %arg0, %c2_i32 : i32
    %1 = arith.addi %0, %arg1 : i32
    %c0_i32 = arith.constant 0 : i32
    %c0_i32_0 = arith.constant 0 : i32
    return %c0_i32, %1 : i32, i32
  }
  func.func @transform_2(%arg0: i32, %arg1: i32) -> (i32, i32) {
    %c0_i32 = arith.constant 0 : i32
    %c0_i32_0 = arith.constant 0 : i32
    return %arg0, %c0_i32 : i32, i32
  }
}

</mosaic_0001>

<bundles_post_ra>
// kernel: dsdh_loss.1
= control target key start
LH: loop header
LB: loop body
LE: loop exit
PB: predicated region body
PF: predicated region fallthrough
CT: control target
= control target key end

     0   :  { %s597_s9 = smov 0   ;;  %s599_s10 = smov 0   ;;  %s711_s0 = inlined_call_operand.vmem [shape: f32[16,40], index: 0, kind: input, shape index: {}]   ;;  %s712_s1 = inlined_call_operand.vmem [shape: f32[40,1024], index: 1, kind: input, shape index: {}]   ;;  %s713_s2 = inlined_call_operand.vmem [shape: f32[16,256], index: 2, kind: output, shape index: {}]  }
   0x1   :  { %s601_s11 = smov 0   ;;  %s603_s12 = smov 0  }
   0x2   :  { %s605_s13 = smov 0   ;;  %s607_s14 = smov 0  }
   0x3   :  { %s609_s15 = smov 0  }
   0x4 LB: > { %s21_s16 = sadd.s32 1, %s570_s13  ;;  %s24_s17 = sadd.s32 1, %s574_s14  ;;  %s578_s15 = sphi %s609_s15, %s12_s15   ;;  %s574_s14 = sphi %s607_s14, %s719_s14   ;;  %s570_s13 = sphi %s605_s13, %s718_s13   ;;  %s566_s12 = sphi %s603_s12, %s717_s12   ;;  %s562_s11 = sphi %s601_s11, %s716_s11   ;;  %s558_s10 = sphi %s599_s10, %s715_s10   ;;  %s554_s9 = sphi %s597_s9, %s714_s9  }
   0x5   : > { %p22_p0 = scmp.ge.s32.totalorder %s21_s16, 2  ;;  %p63_p1 = scmp.ne.s32.totalorder %s558_s10, %s554_s9 }
   0x6   : > { %p64_p2 = scmp.eq.s32.totalorder %s578_s15, 0  ;;  %s425_s18 = sshll.u32 %s574_s14, 1 }
   0x7   : > { %s721_s16 = smov (%p22_p0, %s21_s16), 0  ;;  %s723_s17 = smov (!%p22_p0, %s24_s17), %s574_s14 }
   0x8   : > { %p26_p3 = scmp.ge.s32.totalorder %s723_s17, 2  ;;  %p65_p4 = por %p64_p2, %p63_p1 }
   0x9   : > { %s50_s19 = sadd.s32 %s570_s13, %s425_s18  ;;  %s56_s23 = sadd.s32 1, %s558_s10 }
   0xa   : > { %s725_s17 = smov (%p26_p3, %s723_s17), 0  ;;  %p428_p6 = scmp.ge.s32.totalorder %s578_s15, 4 }
   0xb   : > { %s426_s20 = sshll.u32 %s725_s17, 1 }
   0xc   : > { %s52_s21 = sadd.s32 %s426_s20, %s721_s16  ;;  %118 = sbr.rel (%p428_p6) target bundleno = 28 (0x1c), region = 20 }
   0xd   : > { %s53_s22 = ssub.s32 %s50_s19, %s52_s21 }
   0xe   : > { %p54_p5 = scmp.eq.s32.totalorder %s53_s22, 0 }
  0x10   : > { %s648_s24 = scalar_select %p54_p5, %s558_s10, %s56_s23  }
  0x13   : > { %121 = sbr.rel (!%p65_p4) target bundleno = 28 (0x1c), region = 24  ;;  %s123_s25 = sand.u32 (%p65_p4), 1, %s558_s10  }
  0x14   : > { %s440_s26 = sshll.u32 (%p65_p4), %s50_s19, 4  ;;  %s456_s27 = smul.u32 (%p65_p4), 80, %s123_s25 }
  0x15   : > { %s130_s30 = scalar_lea.vmem (%p65_p4), %s712_s1, %s440_s26 }
  0x16   : > { %v143_v0 = vld [vmem:[%s130_s30] sm:$0xff] (%p65_p4)  ;;  %v145_v1 = vld [vmem:[%s130_s30 + $0x8] sm:$0xff] (%p65_p4)  ;;  %s125_s3 = scalar_lea.vmem (%p65_p4), [#allocation2], %s456_s27 }
  0x17   : > { %v147_v2 = vld [vmem:[%s130_s30 + $0x40] sm:$0xff] (%p65_p4)  ;;  %v149_v3 = vld [vmem:[%s130_s30 + $0x48] sm:$0xff] (%p65_p4)  ;;  %144 = vst [vmem:[%s125_s3] sm:$0xff] (%p65_p4), %v143_v0  ;;  %146 = vst [vmem:[%s125_s3 + $0x8] sm:$0xff] (%p65_p4), %v145_v1 }
  0x18   : > { %v151_v4 = vld [vmem:[%s130_s30 + $0x80] sm:$0xff] (%p65_p4)  ;;  %v153_v5 = vld [vmem:[%s130_s30 + $0x88] sm:$0xff] (%p65_p4)  ;;  %148 = vst [vmem:[%s125_s3 + $0x10] sm:$0xff] (%p65_p4), %v147_v2  ;;  %150 = vst [vmem:[%s125_s3 + $0x18] sm:$0xff] (%p65_p4), %v149_v3 }
  0x19   : > { %152 = vst [vmem:[%s125_s3 + $0x20] sm:$0xff] (%p65_p4), %v151_v4  ;;  %154 = vst [vmem:[%s125_s3 + $0x28] sm:$0xff] (%p65_p4), %v153_v5  ;;  %v155_v6 = vld [vmem:[%s130_s30 + $0xc0] sm:$0xff] (%p65_p4)  ;;  %v157_v7 = vld [vmem:[%s130_s30 + $0xc8] sm:$0xff] (%p65_p4) }
  0x1a   : > { %v159_v8 = vld [vmem:[%s130_s30 + $0x100] sm:$0xff]  ;;  %156 = vst [vmem:[%s125_s3 + $0x30] sm:$0xff] %v155_v6  ;;  %158 = vst [vmem:[%s125_s3 + $0x38] sm:$0xff] %v157_v7  ;;  %v161_v9 = vld [vmem:[%s130_s30 + $0x108] sm:$0xff] }
  0x1b   : > { %160 = vst [vmem:[%s125_s3 + $0x40] sm:$0xff] %v159_v8  ;;  %162 = vst [vmem:[%s125_s3 + $0x48] sm:$0xff] %v161_v9 }
  0x1c PF: > { %p432_p7 = scmp.ge.s32.totalorder %s578_s15, 1  ;;  %p167_p8 = scmp.lt.s32.totalorder %s578_s15, 5 }
  0x1e   : > { %p168_p9 = pnand %p432_p7, %p167_p8 }
  0x1f   : > { %s174_s4 = sand.u32 (!%p168_p9), 1, %s554_s9   ;;  %p198_p10 = scmp.lt.s32.totalorder (!%p168_p9), %s566_s12, 1 }
  0x20   : > { %171 = sbr.rel (%p168_p9) target bundleno = 312 (0x138), region = 47  ;;  %p435_p11 = scmp.ne.s32.totalorder (!%p168_p9), %s562_s11, 0 }
  0x21   : > { %s457_s5 = smul.u32 (!%p168_p9), 80, %s174_s4 }
  0x23   : > { %s665_s19 = scalar_lea.vmem (!%p168_p9), [#allocation2], %s457_s5 }
  0x27   : > { %s727_s12 = smov (!%p198_p10, %s566_s12), 1  ;;  %206 = sbr.rel (%p435_p11) target bundleno = 46 (0x2e), region = 55 }
  0x28   : > { %s441_s6 = sshll.u32 %s727_s12, 4  ;;  %v580_v10 = vmov (!%p435_p11), 0.0  }
  0x29   : > { %s663_s18 = scalar_lea.vmem %s713_s2, %s441_s6 }
  0x2a   : > { %207 = vst [vmem:[%s663_s18] sm:$0xff] (!%p435_p11), %v580_v10  ;;  %208 = vst [vmem:[%s663_s18 + $0x8] sm:$0xff] (!%p435_p11), %v580_v10 }
  0x2e PF: > { %v212_v11 = vld [vmem:[%s665_s19 + $0x8] sm:$0xff]  ;;  %v214_v12 = vld [vmem:[%s665_s19 + $0x18] sm:$0xff]  ;;  %v211_v13 = vld [vmem:[%s665_s19] sm:$0xff]  ;;  %v581_v18 = vmov 0.0   ;;  %vm221_vm0 = vcmask 326656  }
  0x2f   : > { %v442_v14 = vpack.c.bf16 %v214_v12, %v212_v11  ;;  %v213_v15 = vld [vmem:[%s665_s19 + $0x10] sm:$0xff]  ;;  %v216_v16 = vld [vmem:[%s665_s19 + $0x28] sm:$0xff]  ;;  %v218_v17 = vld [vmem:[%s665_s19 + $0x38] sm:$0xff]  ;;  %292 = vmatprep.mubr.f32.mxu0 %v581_v18  ;;  %298 = vmatprep.mubr.f32.mxu1 %v581_v18 }
  0x30   : > { %v444_v19 = vpack.c.bf16 %v213_v15, %v211_v13  ;;  %v446_v20 = vpack.c.bf16 %v218_v17, %v216_v16  ;;  %v215_v21 = vld [vmem:[%s665_s19 + $0x20] sm:$0xff]  ;;  %v217_v22 = vld [vmem:[%s665_s19 + $0x30] sm:$0xff]  ;;  %v220_v24 = vld [vmem:[%s665_s19 + $0x48] sm:$0xff] }
  0x31   : > { %443 = vmatprep.subr.bf16.mxu0 %v442_v14  ;;  %450 = vmatprep.subr.bf16.mxu1 %v442_v14  ;;  %v448_v23 = vpack.c.bf16 %v217_v22, %v215_v21  ;;  %v219_v25 = vld [vmem:[%s665_s19 + $0x40] sm:$0xff]  ;;  %v210_v27 = vld [vmem:[%s711_s0 + $0x8] sm:$0xff] }
  0x32   : > { %445 = vmatpush1.bf16.msra.mxu0 %v444_v19  ;;  %453 = vmatpush1.bf16.msra.mxu1 %v444_v19  ;;  %v209_v26 = vld [vmem:[%s711_s0] sm:$0xff]  ;;  %v344_v2 = vld [vmem:[%s663_s18 + $0x8] sm:$0xff] }
  0x33   : > { %447 = vmatprep.subr.bf16.mxu0 %v446_v20  ;;  %451 = vmatprep.subr.bf16.mxu1 %v446_v20  ;;  %v343_v62 = vld [vmem:[%s663_s18] sm:$0xff] }
  0x36   : > { %449 = vmatpush1.bf16.msra.mxu0 %v448_v23  ;;  %454 = vmatpush1.bf16.msra.mxu1 %v448_v23 }
  0x37   : > { %236 = vmatprep.subr.mxu0 %v220_v24  ;;  %452 = vmatprep.subr.mxu1 %v220_v24 }
  0x3a   : > { %237 = vmatpush1.msra.mxu0 %v219_v25  ;;  %455 = vmatpush1.msra.mxu1 %v219_v25 }
  0x3b   : > { %436 = vmatmul.mubr.msk.f32.vlgmr.msra.gmra.mrb[0].mxu0 %vm221_vm0, %v209_v26  ;;  %437 = vmatmul.mubr.msk.f32.vlgmr.msra.gmra.mrb[0].mxu1 %vm221_vm0, %v210_v27 }
 0x10e   : > { %v294_v28 = vpop.f32.mrb[0].mxu0  ;;  %v300_v29 = vpop.f32.mrb[0].mxu1 }
 0x10f   : > { %v305_v30 = vmul.f32 0.5, %v294_v28  ;;  %v296_v31 = vpop.f32.mrb[1].mxu0  ;;  %v302_v32 = vpop.f32.mrb[1].mxu1  ;;  %vm307_vm1 = vcmp.gt.f32.partialorder %v300_v29, 0.0 }
 0x110   : > { %v306_v33 = vmul.f32 0.5, %v296_v31  ;;  %vm308_vm2 = vcmp.gt.f32.partialorder %v302_v32, 0.0 }
 0x111   : > { %v309_v34 = vand.u32 2147483647, %v305_v30  ;;  %v335_v35 = vsub.f32 0.0, %v305_v30 }
 0x112   : > { %v310_v36 = vand.u32 2147483647, %v306_v33  ;;  %v336_v37 = vsub.f32 0.0, %v306_v33 }
 0x113   : > { %v311_v38 = vsub.f32 0.0, %v309_v34  ;;  %v337_v39 = vsel %vm307_vm1, %v335_v35, %v305_v30 }
 0x114   : > { %v312_v40 = vsub.f32 0.0, %v310_v36  ;;  %v338_v41 = vsel %vm308_vm2, %v336_v37, %v306_v33  ;;  %v339_v58 = vmax.f32 %v337_v39, 0.0 }
 0x115   : > { %v313_v42 = vmul.f32 1.442695, %v311_v38  ;;  %v340_v63 = vmax.f32 %v338_v41, 0.0 }
 0x116   : > { %v315_v43 = vmul.f32 1.442695, %v312_v40 }
 0x117   : > { %516 = vpow2.f32 %v313_v42 }
 0x118   : > { %518 = vpow2.f32 %v315_v43 }
 0x121   : > { %v517_v44 = vpop.eup %516 }
 0x122   : > { %v519_v45 = vpop.eup %518  ;;  %v317_v46 = vadd.f32 1.0, %v517_v44  ;;  %v320_v48 = vmul.f32 -0.5, %v517_v44  ;;  %v323_v51 = vand.u32 2147483647, %v517_v44 }
 0x123   : > { %v326_v47 = vadd.f32 1.0, %v519_v45  ;;  %v329_v49 = vmul.f32 -0.5, %v519_v45  ;;  %v332_v53 = vand.u32 2147483647, %v519_v45 }
 0x124   : > { %520 = vlog2.f32 %v317_v46  ;;  %v321_v50 = vadd.f32 1.0, %v320_v48  ;;  %vm324_vm3 = vcmp.lt.f32.partialorder %v323_v51, 0.0004427343 }
 0x125   : > { %522 = vlog2.f32 %v326_v47  ;;  %v330_v52 = vadd.f32 1.0, %v329_v49  ;;  %vm333_vm4 = vcmp.lt.f32.partialorder %v332_v53, 0.0004427343 }
 0x126   : > { %v322_v57 = vmul.f32 %v517_v44, %v321_v50 }
 0x127   : > { %v331_v60 = vmul.f32 %v519_v45, %v330_v52 }
 0x12e   : > { %v521_v54 = vpop.eup %520 }
 0x12f   : > { %v523_v55 = vpop.eup %522  ;;  %v319_v56 = vmul.f32 0.6931472, %v521_v54 }
 0x130   : > { %v328_v59 = vmul.f32 0.6931472, %v523_v55 }
 0x131   : > { %v325_v61 = vsel %vm324_vm3, %v322_v57, %v319_v56 }
 0x132   : > { %v341_v0 = vadd.f32 %v339_v58, %v325_v61  ;;  %v334_v1 = vsel %vm333_vm4, %v331_v60, %v328_v59 }
 0x133   : > { %v342_v3 = vadd.f32 %v340_v63, %v334_v1 }
 0x134   : > { %v345_v4 = vadd.f32 %v343_v62, %v341_v0 }
 0x135   : > { %v346_v5 = vadd.f32 %v344_v2, %v342_v3 }
 0x136   : > { %347 = vst [vmem:[%s663_s18] sm:$0xff] %v345_v4 }
 0x137   : > { %348 = vst [vmem:[%s663_s18 + $0x8] sm:$0xff] %v346_v5 }
 0x138 PF: > { %s12_s15 = sadd.s32 1, %s578_s15   ;;  %s714_s9 = smov %s558_s10 }
 0x139   : > { %p9_p12 = scmp.ge.s32.totalorder %s12_s15, 6   ;;  %s715_s10 = smov %s648_s24 }
 0x13a   : > { %s716_s11 = smov %s570_s13  ;;  %s717_s12 = smov %s574_s14 }
 0x13b   : > { %s718_s13 = smov %s721_s16  ;;  %s719_s14 = smov %s725_s17 }
 0x13c   :  { %11 = sbr.rel (!%p9_p12) target bundleno = 4 (0x4), region = 90 }

</bundles_post_ra>
